<compile_context>
chip_gen: v5e
topology: v5e:2x2
jax: 0.10.0
libtpu: 0.0.40
codegen_flags: <defaults>
</compile_context>

<pallas_src>
import functools

import jax
import jax.numpy as jnp
import numpy as np
from jax.experimental import pallas as pl
from jax.experimental.pallas import tpu as pltpu


# ---------------------------------------------------------------------------
# One-off device probe: pltpu.roll rotation direction (cached).
#   True  -> pltpu.roll(x, s, axis)[..., i] == x[..., (i - s) % n]  (np.roll)
#   False -> opposite direction.
# ---------------------------------------------------------------------------
@functools.lru_cache(maxsize=None)
def _roll_is_numpy_convention() -> bool:
    def probe(x_ref, o_ref):
        o_ref[...] = pltpu.roll(x_ref[...], 1, axis=1)

    x = jnp.tile(jnp.arange(128, dtype=jnp.float32)[None, :], (8, 1))
    out = pl.pallas_call(
        probe, out_shape=jax.ShapeDtypeStruct((8, 128), jnp.float32))(x)
    return bool(np.asarray(jax.device_get(out))[0, 0] == 127.0)


# ---------------------------------------------------------------------------
# Fused kernel: `nb` images per grid step, channel-major.
#   x_ref : (Cin,  L)       input slab, L = nb*H*W (images flat on lanes), f32
#   a1,b1 : (Cin, 1)        folded BN1 scale/shift, f32
#   w1_ref: (Cmid, Cin)     conv1 weight^T with BN2 scale folded in, bf16
#   b2    : (Cmid, 1)       folded BN2 shift, f32
#   w2_ref: (9*Cout, Cmid)  conv2 taps stacked row-wise (tap t = dy*3+dx), bf16
#   m_ref : (9, 1, L)       per-tap zero-padding boundary masks, f32
#   o_ref : (Cout, L)       output slab (lane-dense store)
# ---------------------------------------------------------------------------
def dense_layer_kernel(x_ref, a1_ref, b1_ref, w1_ref, b2_ref, w2_ref, m_ref,
                       o_ref, *, tap_shifts):
    cout = o_ref.shape[0]

    # bn1 -> relu1 (f32 VPU), conv1x1 on the MXU: bf16 operands, f32 accumulation.
    y = jnp.maximum(x_ref[...] * a1_ref[...] + b1_ref[...], 0.0)    # (Cin, L)
    act = jnp.dot(w1_ref[...], y.astype(w1_ref.dtype),
                  preferred_element_type=jnp.float32)               # (Cmid, L)
    act = jnp.maximum(act + b2_ref[...], 0.0)                       # bn2 shift + relu2

    # conv2 (3x3, pad=1): all 9 taps in ONE stacked matmul at width L, then each
    # non-centre tap is realized as an XLU lane roll + boundary-mask multiply-add.
    prod = jnp.dot(w2_ref[...], act.astype(w2_ref.dtype),
                   preferred_element_type=jnp.float32)              # (9*Cout, L)

    acc = prod[4 * cout:5 * cout, :]          # centre tap: no roll, mask == 1 everywhere
    for t, shift in tap_shifts:               # 8 static taps, unrolled
        tap = prod[t * cout:(t + 1) * cout, :]
        if shift:
            tap = pltpu.roll(tap, shift, axis=1)
        acc = acc + tap * m_ref[t]            # (1, L) mask broadcast over Cout sublanes
    o_ref[...] = acc.astype(o_ref.dtype)


# ---------------------------------------------------------------------------
# Wrapper
# ---------------------------------------------------------------------------
def _choose_images_per_step(N, Cin, Cmid, Cout, HW):
    """Largest divisor of N that fits a conservative VMEM budget, keeping grid >= 2."""
    # Rough live bytes per lane column: x (double-buffered f32), act (f32 + bf16
    # copy), prod, acc, out (double-buffered), masks (9 taps padded to 8 sublanes).
    col_bytes = (2 * Cin * 4 + Cmid * 6 + 9 * Cout * 4 + Cout * 4
                 + 2 * Cout * 4 + 9 * 8 * 4)
    budget = 24 * 1024 * 1024        # headroom under 32 MiB scoped VMEM (v7x-safe)
    cap = max(1, budget // (col_bytes * HW))
    divisors = [d for d in range(1, N + 1) if N % d == 0]
    good = [d for d in divisors if d <= cap and N // d >= 2]   # keep both v7x TCs busy
    if good:
        return max(good)
    return max(d for d in divisors if d <= cap)


def dense_layer_forward(x_nchw, params, eps=1e-5, drop_rate=0.0,
                        images_per_step=None, out_dtype=jnp.float32):
    N, Cin, H, W = x_nchw.shape
    Cmid = params["w1"].shape[1]
    Cout = params["w2"].shape[-1]
    HW = H * W

    nb = (_choose_images_per_step(N, Cin, Cmid, Cout, HW)
          if images_per_step is None else images_per_step)
    assert N % nb == 0, (N, nb)
    L = nb * HW

    # Fold eval-mode BatchNorm into per-channel affine: y = x * a + b.
    a1 = params["gamma1"] / jnp.sqrt(params["var1"] + eps)
    b1 = params["beta1"] - params["mean1"] * a1
    a2 = params["gamma2"] / jnp.sqrt(params["var2"] + eps)
    b2 = params["beta2"] - params["mean2"] * a2
    a1 = a1.reshape(Cin, 1)
    b1 = b1.reshape(Cin, 1)
    b2c = b2.reshape(Cmid, 1)

    # Fold BN2 scale into the 1x1 conv rows (exact: conv1 has no bias, and the
    # b2 shift + ReLU are applied after the matmul inside the kernel). bf16 MXU weights.
    w1t = (params["w1"].T * a2[:, None]).astype(jnp.bfloat16)        # (Cmid, Cin)
    # conv2 taps: HWIO (3,3,Cmid,Cout) -> (9*Cout, Cmid), tap-major rows.
    w2s = jnp.transpose(params["w2"], (0, 1, 3, 2)).reshape(9 * Cout, Cmid)
    w2s = w2s.astype(jnp.bfloat16)

    # Per-tap zero-padding boundary masks for one image, tiled across the nb
    # images sharing a lane slab (compile-time constants).
    hs, ws = np.meshgrid(np.arange(H), np.arange(W), indexing="ij")
    masks_np = np.zeros((9, 1, HW), np.float32)
    for dy in range(3):
        for dx in range(3):
            valid = ((hs + dy - 1 >= 0) & (hs + dy - 1 < H) &
                     (ws + dx - 1 >= 0) & (ws + dx - 1 < W))
            masks_np[dy * 3 + dx, 0, :] = valid.reshape(-1).astype(np.float32)
    masks = jnp.asarray(np.tile(masks_np, (1, 1, nb)))                # (9, 1, L)

    # Static lane shifts realizing each tap offset, using the probed roll direction:
    # we need rolled[p] = tap[(p + off) % L].
    np_roll = _roll_is_numpy_convention()
    tap_shifts = []
    for dy in range(3):
        for dx in range(3):
            if dy == 1 and dx == 1:
                continue                          # centre tap handled separately
            off = (dy - 1) * W + (dx - 1)
            shift = (-off) % L if np_roll else off % L
            tap_shifts.append((dy * 3 + dx, shift))
    tap_shifts = tuple(tap_shifts)

    # Channel-major slab: images flattened onto the lane axis.
    x_cm = jnp.transpose(x_nchw, (1, 0, 2, 3)).reshape(Cin, N * HW)

    kern = functools.partial(dense_layer_kernel, tap_shifts=tap_shifts)
    out_cm = pl.pallas_call(
        kern,
        out_shape=jax.ShapeDtypeStruct((Cout, N * HW), out_dtype),
        grid=(N // nb,),
        in_specs=[
            pl.BlockSpec((Cin, L), lambda g: (0, g)),
            pl.BlockSpec((Cin, 1), lambda g: (0, 0)),
            pl.BlockSpec((Cin, 1), lambda g: (0, 0)),
            pl.BlockSpec((Cmid, Cin), lambda g: (0, 0)),
            pl.BlockSpec((Cmid, 1), lambda g: (0, 0)),
            pl.BlockSpec((9 * Cout, Cmid), lambda g: (0, 0)),
            pl.BlockSpec((9, 1, L), lambda g: (0, 0, 0)),
        ],
        out_specs=pl.BlockSpec((Cout, L), lambda g: (0, g)),
        compiler_params=pltpu.CompilerParams(
            dimension_semantics=("parallel",),
            vmem_limit_bytes=32 * 1024 * 1024),
    )(x_cm, a1, b1, w1t, b2c, w2s, masks)

    # drop_rate > 0: F.dropout in eval mode is identity.
    # TODO(synk): training-mode dropout (pltpu.prng_* masking) not implemented.
    del drop_rate

    return jnp.transpose(out_cm.reshape(Cout, N, H, W), (1, 0, 2, 3))


# ---------------------------------------------------------------------------
# Pure-JAX reference (eval-mode semantics, same weight layout)
# ---------------------------------------------------------------------------
def reference_forward(x_nchw, params, eps=1e-5):
    a1 = params["gamma1"] / jnp.sqrt(params["var1"] + eps)
    b1 = params["beta1"] - params["mean1"] * a1
    a2 = params["gamma2"] / jnp.sqrt(params["var2"] + eps)
    b2 = params["beta2"] - params["mean2"] * a2

    x = jnp.transpose(x_nchw, (0, 2, 3, 1))                 # NHWC
    y = jnp.maximum(x * a1 + b1, 0.0)
    y = jnp.einsum("nhwc,cd->nhwd", y, params["w1"],
                   precision=jax.lax.Precision.HIGHEST)
    z = jnp.maximum(y * a2 + b2, 0.0)
    z = jax.lax.conv_general_dilated(
        z, params["w2"], window_strides=(1, 1), padding="SAME",
        dimension_numbers=("NHWC", "HWIO", "NHWC"),
        precision=jax.lax.Precision.HIGHEST)
    return jnp.transpose(z, (0, 3, 1, 2))


# ---------------------------------------------------------------------------
# Deterministic parameter init (shapes from _DenseLayer.__init__)
# ---------------------------------------------------------------------------
def init_params(key, num_input_features, growth_rate, bn_size):
    cin = num_input_features
    cmid = bn_size * growth_rate
    cout = growth_rate
    ks = jax.random.split(key, 10)
    return {
        # conv1: 1x1, (Cin, Cmid)  ~ PyTorch weight (Cmid, Cin, 1, 1) transposed
        "w1": jax.random.normal(ks[0], (cin, cmid), jnp.float32) * 0.05,
        # conv2: 3x3, HWIO (3, 3, Cmid, Cout)
        "w2": jax.random.normal(ks[1], (3, 3, cmid, cout), jnp.float32) * 0.05,
        # BatchNorm1 (over Cin channels)
        "gamma1": jax.random.uniform(ks[2], (cin,), jnp.float32, 0.5, 1.5),
        "beta1": jax.random.normal(ks[3], (cin,), jnp.float32) * 0.1,
        "mean1": jax.random.normal(ks[4], (cin,), jnp.float32) * 0.1,
        "var1": jax.random.uniform(ks[5], (cin,), jnp.float32, 0.5, 1.5),
        # BatchNorm2 (over Cmid channels)
        "gamma2": jax.random.uniform(ks[6], (cmid,), jnp.float32, 0.5, 1.5),
        "beta2": jax.random.normal(ks[7], (cmid,), jnp.float32) * 0.1,
        "mean2": jax.random.normal(ks[8], (cmid,), jnp.float32) * 0.1,
        "var2": jax.random.uniform(ks[9], (cmid,), jnp.float32, 0.5, 1.5),
    }


if __name__ == "__main__":
    # Module config: num_input_features=32, growth_rate=16, bn_size=4, drop_rate=0
    N, Cin, H, W = 2, 32, 16, 16
    growth_rate, bn_size = 16, 4

    key = jax.random.PRNGKey(0)
    k_x, k_p = jax.random.split(key)
    x = jax.random.normal(k_x, (N, Cin, H, W), jnp.float32)   # NCHW like PyTorch
    params = init_params(k_p, Cin, growth_rate, bn_size)

    _roll_is_numpy_convention()          # run the roll-direction probe outside jit

    fwd = jax.jit(functools.partial(dense_layer_forward, drop_rate=0.0))
    out = jax.block_until_ready(fwd(x, params))
    ref = jax.block_until_ready(reference_forward(x, params))

    assert out.shape == (N, growth_rate, H, W), out.shape
    # bf16 MXU operands with f32 accumulation: 5e-3 vs a HIGHEST-precision f32
    # reference (the all-f32 variant meets 2e-3; real bugs show errors >= 5e-2).
    np.testing.assert_allclose(np.asarray(out), np.asarray(ref),
                               rtol=5e-3, atol=5e-3)
    print("KERNEL_OK")
</pallas_src>

<mosaic_0001>
module attributes {stable_mosaic.version = 11 : i64} {
  func.func @probe(%arg0: memref<8x128xf32, #tpu.memory_space<vmem>>, %arg1: memref<8x128xf32, #tpu.memory_space<vmem>>) attributes {dimension_semantics = [], scalar_prefetch = 0 : i64, scratch_operands = 0 : i64, tpu.core_type = #tpu.core_type<tc>} {
    %c0 = arith.constant 0 : index
    %c0_0 = arith.constant 0 : index
    %0 = vector.load %arg0[%c0, %c0_0] : memref<8x128xf32, #tpu.memory_space<vmem>>, vector<8x128xf32>
    %c1_i32 = arith.constant 1 : i32
    %1 = tpu.dynamic_rotate %0 by %c1_i32 dim 1 : vector<8x128xf32>, i32 -> vector<8x128xf32>
    %c0_1 = arith.constant 0 : index
    %c0_2 = arith.constant 0 : index
    %2 = vector.load %arg1[%c0_1, %c0_2] : memref<8x128xf32, #tpu.memory_space<vmem>>, vector<8x128xf32>
    tpu.vector_store %arg1[%c0_1, %c0_2], %1 {strides = array<i32>} : memref<8x128xf32, #tpu.memory_space<vmem>>, vector<8x128xf32>,
    return
  }
}

</mosaic_0001>

<bundles_post_ra>
// kernel: tpu_custom_call.1
= control target key start
LH: loop header
LB: loop body
LE: loop exit
PB: predicated region body
PF: predicated region fallthrough
CT: control target
= control target key end

     0   :  { %6 = vsyncpa [#allocation3], 0  ;;  %s118_s0 = inlined_call_operand.hbm [shape: f32[8,128], index: 0, kind: input, shape index: {}]   ;;  %s119_s1 = inlined_call_operand.hbm [shape: f32[8,128], index: 1, kind: output, shape index: {}]  }
   0x1   :  { %7 = vsyncpa [#allocation4], 0  ;;  %s13_s8 = sshll.u32 %s118_s0, 4  ;;  %s99_s9 = smov [#allocation2]   ;;  %s14_s8 = int_to_ptr.hbm [resolvable:$true] %s13_s8 }
   0x2   :  { %s15_s10 = sshll.u32 %s99_s9, 4  ;;  %s16_s10 = int_to_ptr.vmem [resolvable:$true] %s15_s10 }
   0x3   :  { %18 = dma.hbm_to_vmem [thread:$0]  %s14_s8, 128, %s16_s10, [#allocation3]  }
   0x4   :  { %95 = dma.done.wait [#allocation3], 128  }
   0x5   :  { %96 = vsyncadd [#allocation3], 4294967168  ;;  %v23_v0 = vld [vmem:[#allocation2] sm:$0xff]  ;;  %s100_s11 = smov 1   ;;  %s101_s12 = smov [#allocation5]  }
   0x6   :  { %24 = vrot.lane.b32.xlu0 %v23_v0, %s100_s11  ;;  %s32_s13 = sshll.u32 %s101_s12, 4  ;;  %s34_s16 = sshll.u32 %s119_s1, 4  ;;  %s33_s13 = int_to_ptr.vmem [resolvable:$true] %s32_s13  ;;  %s35_s16 = int_to_ptr.hbm [resolvable:$true] %s34_s16 }
  0x78   :  { %v25_v1 = vpop.permute.xlu0 %24 }
  0x79   :  { %26 = vst [vmem:[#allocation5] sm:$0xff] %v25_v1 }
  0x7a   :  { %37 = dma.vmem_to_hbm [thread:$0]  %s33_s13, 128, %s35_s16, [#allocation4]  }
  0x7b   :  { %97 = dma.done.wait [#allocation4], 128  }
  0x7c   :  { %98 = vsyncadd [#allocation4], 4294967168 }
  0x7d   :  { %42 = vsyncpa [#allocation3], 1 }
  0x7e   :  { %43 = vsyncpa [#allocation4], 1 }

</bundles_post_ra>
